<compile_context>
chip_gen: v6e
topology: v6e:2x2x1
jax: 0.10.0
libtpu: 0.0.40
codegen_flags: <defaults>
</compile_context>

<pallas_src>
import math

import jax
import jax.numpy as jnp
from jax.experimental import pallas as pl
from jax.experimental.pallas import tpu as pltpu

# ---- model config (small, consistent with the module) -----------------------
B = 2          # batch
T = 8          # sequence length (block_size)
C = 32         # n_embd
N_HEAD = 4     # n_head
D_HEAD = C // N_HEAD


# ---- fused kernel: qkv projection + causal attention + output projection ----
def causal_attn_kernel(x_ref, wqkv_ref, bqkv_ref, wproj_ref, bproj_ref,
                       bias_ref, o_ref):
    # x_ref:     (BT, C)    flattened tokens
    # wqkv_ref:  (C, 3C)    qkv projection (q columns pre-scaled by 1/sqrt(D))
    # bqkv_ref:  (1, 3C)    qkv bias (q part pre-scaled)
    # wproj_ref: (C, C)     output projection
    # bproj_ref: (1, C)
    # bias_ref:  (BT, BT)   additive causal + block-diagonal mask (0 / -1e30)
    # o_ref:     (BT, C)
    BT, Cc = x_ref.shape
    H = N_HEAD
    D = Cc // H

    x = x_ref[...]                                               # (BT, C)

    # --- fused QKV projection: one MXU matmul -------------------------------
    qkv = jnp.dot(x, wqkv_ref[...],
                  preferred_element_type=jnp.float32) + bqkv_ref[...]  # (BT, 3C)

    # One head-major relayout, then cheap leading-dim slices.
    qkv_h = qkv.reshape(BT, 3 * H, D).transpose(1, 0, 2)         # (3H, BT, D)
    q = qkv_h[:H]                                                # (H, BT, D)
    k = qkv_h[H:2 * H]
    v = qkv_h[2 * H:]

    # --- attention scores for all (batch, head) pairs at once ---------------
    # Scores run over the flattened B*T token axis; cross-batch entries are
    # killed by the precomputed additive block-diagonal causal bias.
    s = jnp.einsum('hnd,hmd->hnm', q, k,
                   preferred_element_type=jnp.float32)           # (H, BT, BT)
    s = s + bias_ref[...][None]

    # --- softmax (exact divide; kernel is latency-bound, approx buys nothing)
    m = jnp.max(s, axis=-1, keepdims=True)
    p = jnp.exp(s - m)
    probs = p / jnp.sum(p, axis=-1, keepdims=True)               # (H, BT, BT)

    # --- attention-weighted values + single output projection ---------------
    y = jnp.einsum('hnm,hmd->hnd', probs, v,
                   preferred_element_type=jnp.float32)           # (H, BT, D)
    yc = y.transpose(1, 0, 2).reshape(BT, Cc)                    # (BT, C)
    out = jnp.dot(yc, wproj_ref[...],
                  preferred_element_type=jnp.float32) + bproj_ref[...]

    # TODO(synk): attn_dropout / resid_dropout are identity at inference
    # (dropout=0); no stochastic path implemented.
    o_ref[...] = out.astype(o_ref.dtype)


@jax.jit
def causal_self_attention(x, w_qkv, b_qkv, w_proj, b_proj):
    """x: (B, T, C) f32. w_qkv: (C, 3C), b_qkv: (3C,), w_proj: (C, C), b_proj: (C,)."""
    Bx, Tx, Cx = x.shape
    H = N_HEAD
    D = Cx // H
    BT = Bx * Tx

    # Fold the 1/sqrt(D) attention scale into the q columns (first Cx) of the
    # qkv projection; weights stay single dense slabs (no per-head splits).
    scale = 1.0 / math.sqrt(D)
    col_scale = jnp.concatenate(
        [jnp.full((Cx,), scale, jnp.float32), jnp.ones((2 * Cx,), jnp.float32)])
    w_qkv_s = w_qkv * col_scale[None, :]                          # (C, 3C)
    b_qkv_s = (b_qkv * col_scale).reshape(1, 3 * Cx)              # (1, 3C)
    b_proj2d = b_proj.reshape(1, Cx)                              # (1, C)
    x2d = x.reshape(BT, Cx)

    # Additive causal + block-diagonal (same-batch) bias: compile-time const.
    row = jnp.arange(BT, dtype=jnp.int32)[:, None]
    col = jnp.arange(BT, dtype=jnp.int32)[None, :]
    same_seq = (row // Tx) == (col // Tx)
    causal = (col % Tx) <= (row % Tx)
    bias = jnp.where(same_seq & causal,
                     jnp.float32(0.0), jnp.float32(-1e30))        # (BT, BT)

    out_flat = pl.pallas_call(
        causal_attn_kernel,
        out_shape=jax.ShapeDtypeStruct((BT, Cx), x.dtype),
        in_specs=[pl.BlockSpec(memory_space=pltpu.MemorySpace.VMEM)] * 6,
        out_specs=pl.BlockSpec(memory_space=pltpu.MemorySpace.VMEM),
    )(x2d, w_qkv_s, b_qkv_s, w_proj, b_proj2d, bias)

    return out_flat.reshape(Bx, Tx, Cx)


# ---- plain-JAX reference (mirrors the PyTorch forward, dropout = 0) ----------
def reference(x, w_qkv, b_qkv, w_proj, b_proj):
    Bx, Tx, Cx = x.shape
    H, D = N_HEAD, Cx // N_HEAD
    qkv = x @ w_qkv + b_qkv
    q, k, v = jnp.split(qkv, 3, axis=-1)
    q = q.reshape(Bx, Tx, H, D).transpose(0, 2, 1, 3)
    k = k.reshape(Bx, Tx, H, D).transpose(0, 2, 1, 3)
    v = v.reshape(Bx, Tx, H, D).transpose(0, 2, 1, 3)
    att = jnp.einsum('bhtd,bhsd->bhts', q, k) / math.sqrt(D)
    mask = jnp.tril(jnp.ones((Tx, Tx), dtype=bool))
    att = jnp.where(mask[None, None], att, -jnp.inf)
    att = jax.nn.softmax(att, axis=-1)
    y = jnp.einsum('bhts,bhsd->bhtd', att, v)
    y = y.transpose(0, 2, 1, 3).reshape(Bx, Tx, Cx)
    return y @ w_proj + b_proj


if __name__ == "__main__":
    key = jax.random.PRNGKey(0)
    kx, k1, k2, k3, k4 = jax.random.split(key, 5)

    x = jax.random.normal(kx, (B, T, C), dtype=jnp.float32)

    # Deterministic parameter init (nn.Linear-like scaling), stored as (in, out)
    w_qkv = jax.random.normal(k1, (C, 3 * C), dtype=jnp.float32) * (1.0 / math.sqrt(C))
    b_qkv = jax.random.normal(k2, (3 * C,), dtype=jnp.float32) * 0.02
    w_proj = jax.random.normal(k3, (C, C), dtype=jnp.float32) * (1.0 / math.sqrt(C))
    b_proj = jax.random.normal(k4, (C,), dtype=jnp.float32) * 0.02

    y = causal_self_attention(x, w_qkv, b_qkv, w_proj, b_proj)
    y = jax.block_until_ready(y)

    y_ref = reference(x, w_qkv, b_qkv, w_proj, b_proj)
    assert jnp.allclose(y, y_ref, atol=1e-4, rtol=1e-4), "mismatch vs reference"

    print("KERNEL_OK")
</pallas_src>

<mosaic_0001>
module attributes {stable_mosaic.version = 11 : i64} {
  func.func @causal_attn_kernel(%arg0: memref<16x32xf32, #tpu.memory_space<vmem>>, %arg1: memref<32x96xf32, #tpu.memory_space<vmem>>, %arg2: memref<1x96xf32, #tpu.memory_space<vmem>>, %arg3: memref<32x32xf32, #tpu.memory_space<vmem>>, %arg4: memref<1x32xf32, #tpu.memory_space<vmem>>, %arg5: memref<16x16xf32, #tpu.memory_space<vmem>>, %arg6: memref<16x32xf32, #tpu.memory_space<vmem>>) attributes {dimension_semantics = [], scalar_prefetch = 0 : i64, scratch_operands = 0 : i64, tpu.core_type = #tpu.core_type<tc>} {
    %c0 = arith.constant 0 : index
    %c0_0 = arith.constant 0 : index
    %0 = vector.load %arg0[%c0, %c0_0] : memref<16x32xf32, #tpu.memory_space<vmem>>, vector<16x32xf32>
    %c0_1 = arith.constant 0 : index
    %c0_2 = arith.constant 0 : index
    %1 = vector.load %arg1[%c0_1, %c0_2] : memref<32x96xf32, #tpu.memory_space<vmem>>, vector<32x96xf32>
    %cst = arith.constant dense<0.000000e+00> : vector<16x96xf32>
    %2 = tpu.matmul %0, %1, %cst {dimension_numbers = #tpu.dot_dimension_numbers<[1], [0], [0], [1], [0, 0, 1, 1], [], []>} : vector<16x32xf32>, vector<32x96xf32>, vector<16x96xf32> -> vector<16x96xf32>
    %c0_3 = arith.constant 0 : index
    %c0_4 = arith.constant 0 : index
    %3 = vector.load %arg2[%c0_3, %c0_4] : memref<1x96xf32, #tpu.memory_space<vmem>>, vector<1x96xf32>
    %4 = vector.broadcast %3 : vector<1x96xf32> to vector<16x96xf32>
    %5 = arith.addf %2, %4 : vector<16x96xf32>
    %6 = vector.shape_cast %5 : vector<16x96xf32> to vector<16x12x8xf32>
    %7 = tpu.transpose %6, [1, 0, 2] : vector<16x12x8xf32> -> vector<12x16x8xf32>
    %8 = vector.extract_strided_slice %7 {offsets = [0, 0, 0], sizes = [4, 16, 8], strides = [1, 1, 1]} : vector<12x16x8xf32> to vector<4x16x8xf32>
    %9 = vector.extract_strided_slice %7 {offsets = [4, 0, 0], sizes = [4, 16, 8], strides = [1, 1, 1]} : vector<12x16x8xf32> to vector<4x16x8xf32>
    %10 = vector.extract_strided_slice %7 {offsets = [8, 0, 0], sizes = [4, 16, 8], strides = [1, 1, 1]} : vector<12x16x8xf32> to vector<4x16x8xf32>
    "tpu.trace_start"() <{level = 10 : i32, message = "hnd,hmd->hnm"}> : () -> ()
    %cst_5 = arith.constant dense<0.000000e+00> : vector<4x16x16xf32>
    %11 = tpu.matmul %8, %9, %cst_5 {dimension_numbers = #tpu.dot_dimension_numbers<[2], [2], [1], [1], [0, 0, 0, 1, 1, 1], [0], [0]>} : vector<4x16x8xf32>, vector<4x16x8xf32>, vector<4x16x16xf32> -> vector<4x16x16xf32>
    "tpu.trace_stop"() : () -> ()
    %c0_6 = arith.constant 0 : index
    %c0_7 = arith.constant 0 : index
    %12 = vector.load %arg5[%c0_6, %c0_7] : memref<16x16xf32, #tpu.memory_space<vmem>>, vector<16x16xf32>
    %13 = vector.shape_cast %12 : vector<16x16xf32> to vector<1x16x16xf32>
    %14 = vector.broadcast %13 : vector<1x16x16xf32> to vector<4x16x16xf32>
    %15 = arith.addf %11, %14 : vector<4x16x16xf32>
    %cst_8 = arith.constant dense<0xFF800000> : vector<4x16xf32>
    %16 = vector.multi_reduction <maximumf>, %15, %cst_8 [2] : vector<4x16x16xf32> to vector<4x16xf32>
    %17 = vector.shape_cast %16 : vector<4x16xf32> to vector<4x16x1xf32>
    %18 = vector.broadcast %17 : vector<4x16x1xf32> to vector<4x16x16xf32>
    %19 = arith.subf %15, %18 : vector<4x16x16xf32>
    %20 = math.exp %19 : vector<4x16x16xf32>
    %cst_9 = arith.constant dense<0.000000e+00> : vector<4x16xf32>
    %21 = vector.multi_reduction <add>, %20, %cst_9 [2] : vector<4x16x16xf32> to vector<4x16xf32>
    %22 = vector.shape_cast %21 : vector<4x16xf32> to vector<4x16x1xf32>
    %23 = vector.broadcast %22 : vector<4x16x1xf32> to vector<4x16x16xf32>
    %24 = arith.divf %20, %23 : vector<4x16x16xf32>
    "tpu.trace_start"() <{level = 10 : i32, message = "hnm,hmd->hnd"}> : () -> ()
    %cst_10 = arith.constant dense<0.000000e+00> : vector<4x16x8xf32>
    %25 = tpu.matmul %24, %10, %cst_10 {dimension_numbers = #tpu.dot_dimension_numbers<[2], [1], [1], [2], [0, 0, 0, 1, 1, 2], [0], [0]>} : vector<4x16x16xf32>, vector<4x16x8xf32>, vector<4x16x8xf32> -> vector<4x16x8xf32>
    "tpu.trace_stop"() : () -> ()
    %26 = tpu.transpose %25, [1, 0, 2] : vector<4x16x8xf32> -> vector<16x4x8xf32>
    %27 = vector.shape_cast %26 : vector<16x4x8xf32> to vector<16x32xf32>
    %c0_11 = arith.constant 0 : index
    %c0_12 = arith.constant 0 : index
    %28 = vector.load %arg3[%c0_11, %c0_12] : memref<32x32xf32, #tpu.memory_space<vmem>>, vector<32x32xf32>
    %cst_13 = arith.constant dense<0.000000e+00> : vector<16x32xf32>
    %29 = tpu.matmul %27, %28, %cst_13 {dimension_numbers = #tpu.dot_dimension_numbers<[1], [0], [0], [1], [0, 0, 1, 1], [], []>} : vector<16x32xf32>, vector<32x32xf32>, vector<16x32xf32> -> vector<16x32xf32>
    %c0_14 = arith.constant 0 : index
    %c0_15 = arith.constant 0 : index
    %30 = vector.load %arg4[%c0_14, %c0_15] : memref<1x32xf32, #tpu.memory_space<vmem>>, vector<1x32xf32>
    %31 = vector.broadcast %30 : vector<1x32xf32> to vector<16x32xf32>
    %32 = arith.addf %29, %31 : vector<16x32xf32>
    %c0_16 = arith.constant 0 : index
    %c0_17 = arith.constant 0 : index
    %33 = vector.load %arg6[%c0_16, %c0_17] : memref<16x32xf32, #tpu.memory_space<vmem>>, vector<16x32xf32>
    tpu.vector_store %arg6[%c0_16, %c0_17], %32 {strides = array<i32>} : memref<16x32xf32, #tpu.memory_space<vmem>>, vector<16x32xf32>,
    return
  }
}

</mosaic_0001>

<bundles_post_ra>
// kernel: causal_self_attention.1
= control target key start
LH: loop header
LB: loop body
LE: loop exit
PB: predicated region body
PF: predicated region fallthrough
CT: control target
= control target key end

     0   :  { %vm37_vm0 = vcmask 261120   ;;  %s2838_s0 = inlined_call_operand.vmem [shape: f32[16,32], index: 0, kind: input, shape index: {}]   ;;  %s2839_s1 = inlined_call_operand.vmem [shape: f32[32,96], index: 1, kind: input, shape index: {}]   ;;  %s2840_s2 = inlined_call_operand.vmem [shape: f32[1,96], index: 2, kind: input, shape index: {}]   ;;  %s2841_s3 = inlined_call_operand.vmem [shape: f32[32,32], index: 3, kind: input, shape index: {}]   ;;  %s2842_s4 = inlined_call_operand.vmem [shape: f32[1,32], index: 4, kind: input, shape index: {}]   ;;  %s2843_s5 = inlined_call_operand.vmem [shape: f32[16,16], index: 5, kind: input, shape index: {}]   ;;  %s2844_s6 = inlined_call_operand.hbm [shape: f32[16,32], index: 6, kind: output, shape index: {}]  }
   0x1   :  { %v29_v0 = vld [vmem:[%s2839_s1 + $0x18] sm:$0xff]  ;;  %v28_v1 = vld [vmem:[%s2839_s1 + $0x10] sm:$0xff]  ;;  %v24_v2 = vld [vmem:[%s2838_s0] sm:$0xff] }
   0x2   :  { %2278 = vmatprep.subr.mxu0 %v29_v0  ;;  %v27_v3 = vld [vmem:[%s2839_s1 + $0x8] sm:$0xff]  ;;  %2286 = vmatprep.mubr.msk.f32.mxu0 %vm37_vm0, %v24_v2 }
   0x3   :  { %2279 = vmatpush3.msra.mxu0 %v29_v0 }
   0x4   :  { %11 = vsyncpa [#allocation3], 0  ;;  %2280 = vmatprep.subr.mxu0 %v28_v1  ;;  %v26_v4 = vld [vmem:[%s2839_s1] sm:$0xff]  ;;  %v25_v5 = vld [vmem:[%s2838_s0 + $0x8] sm:$0xff]  ;;  %s2428_s11 = smov 80   ;;  %s2429_s1 = smov 96   ;;  %v192_v13 = vlaneseq }
   0x5   :  { %2281 = vmatpush3.msra.mxu0 %v28_v1  ;;  %v2180_v6 = vld [vmem:[%s2840_s2] ss:$0 sm:$0xff]  ;;  %s2430_s12 = smov 72   ;;  %s2431_s0 = smov 88   ;;  %v2435_v11 = vmov 1983009808  }
   0x6   :  { %2282 = vmatprep.subr.mxu0 %v27_v3  ;;  %s2432_s13 = smov 120   ;;  %s2433_s2 = smov 112   ;;  %v190_v12 = vunpack.c.l.s4 %v2435_v11  ;;  %v2436_v14 = vmov 1934713408   ;;  %v193_v17 = vshrl.u32 %v192_v13, 7  ;;  %vm1005_vm1 = vcmask 64512  }
   0x7   :  { %2283 = vmatpush3.msra.mxu0 %v27_v3  ;;  %s2434_s14 = smov 104   ;;  %v254_v15 = vunpack.c.l.s4 %v2436_v14  ;;  %vm1354_vm2 = vcmask 130048   ;;  %s2438_s19 = smov 48   ;;  %vm2067_vm3 = vcmask 195584  }
   0x8   :  { %2284 = vmatprep.subr.mxu0 %v26_v4  ;;  %v191_v16 = vunpack.c.0.s8 %v190_v12  ;;  %s2439_s20 = smov 40   ;;  %s2440_s21 = smov 56  }
   0x9   :  { %2285 = vmatpush3.msra.mxu0 %v26_v4  ;;  %v255_v20 = vunpack.c.0.s8 %v254_v15  ;;  %s2441_s30 = smov 16   ;;  %s2442_s7 = smov 8  }
   0xa   :  { %2287 = vmatmul.mubr.msk.f32.vlgmr.msra.gmra.mxu0 %vm37_vm0, %v25_v5  ;;  %v2522_v21 = vsub.s32 %v191_v16, %v193_v17  ;;  %s2443_s8 = smov 24   ;;  %s2444_s10 = smov [#allocation2]  }
   0xb   :  { %v2524_v28 = vsub.s32 %v255_v20, %v193_v17 }
  0xca   :  { %v2288_v7 = vpop.f32.mrf.mxu0 }
  0xcb   :  { %v2504_v8 = vadd.f32 %v2288_v7, %v2180_v6 }
  0xcc   :  { %v110_v9 = vpop.f32.mrf.mxu0 }
  0xcd   :  { %153 = vrot.lane.b32.xlu1 %v2504_v8, %s2428_s11  ;;  %141 = vrot.lane.b32.xlu0 %v2504_v8, %s2429_s1  ;;  %v2510_v10 = vadd.f32 %v2180_v6, %v110_v9 }
  0xd1   :  { %159 = vrot.lane.b32.xlu1 %v2504_v8, %s2430_s12  ;;  %147 = vrot.lane.b32.xlu0 %v2504_v8, %s2431_s0 }
  0xd5   :  { %123 = vrot.lane.b32.xlu1 %v2504_v8, %s2432_s13  ;;  %139 = vrot.lane.b32.xlu0 %v2510_v10, %s2429_s1 }
  0xd9   :  { %145 = vrot.lane.b32.xlu1 %v2510_v10, %s2431_s0  ;;  %151 = vrot.lane.b32.xlu0 %v2510_v10, %s2428_s11  ;;  %s2169_s11 = sshll.u32 %s2444_s10, 4  ;;  %s2170_s11 = int_to_ptr.vmem [resolvable:$true] %s2169_s11 }
  0xda   :  { %s2406_s1 = scalar_lea.vmem %s2170_s11, 256  ;;  %p2411_p1 = scmp.lt.s32.totalorder %s2170_s11, %s2170_s11 }
  0xdb   :  { %p2407_p0 = scmp.ne.s32.totalorder %s2170_s11, %s2406_s1  ;;  %p2412_p2 = scmp.lt.s32.totalorder %s2406_s1, %s2406_s1 }
  0xdd   :  { %157 = vrot.lane.b32.xlu1 %v2510_v10, %s2430_s12  ;;  %121 = vrot.lane.b32.xlu0 %v2510_v10, %s2432_s13  ;;  %p2413_p3 = por %p2412_p2, %p2411_p1 }
  0xdf   :  { %p2414_p4 = pnand %p2413_p3, %p2407_p0 }
  0xe1   :  { %127 = vrot.lane.b32.xlu1 %v2510_v10, %s2433_s2  ;;  %133 = vrot.lane.b32.xlu0 %v2510_v10, %s2434_s14 }
  0xe5   :  { %135 = vrot.lane.b32.xlu1 %v2504_v8, %s2434_s14  ;;  %129 = vrot.lane.b32.xlu0 %v2504_v8, %s2433_s2 }
 0x13f   :  { %v154_v18 = vpop.permute.xlu1 %153  ;;  %v142_v19 = vpop.permute.xlu0 %141 }
 0x140   :  { %v423_v22 = vcombine.low %v142_v19, %v154_v18  ;;  %v424_v23 = vcombine.high %v142_v19, %v154_v18 }
 0x142   :  { %v431_v29 = vrot.slane %v423_v22, %v2522_v21  ;;  %v438_v30 = vrot.slane %v424_v23, %v2522_v21 }
 0x143   :  { %v160_v24 = vpop.permute.xlu1 %159  ;;  %v148_v25 = vpop.permute.xlu0 %147 }
 0x144   :  { %v439_v26 = vcombine.low %v148_v25, %v160_v24  ;;  %v440_v27 = vcombine.high %v148_v25, %v160_v24 }
 0x146   :  { %v447_v31 = vrot.slane %v439_v26, %v2522_v21  ;;  %v454_v32 = vrot.slane %v440_v27, %v2522_v21 }
 0x147   :  { %v2530_v33 = vpop.permute.xlu1 %123  ;;  %v140_v34 = vpop.permute.xlu0 %139 }
 0x148   :  { %v487_v35 = vcombine.low %v431_v29, %v447_v31  ;;  %v488_v36 = vcombine.high %v431_v29, %v447_v31  ;;  %v503_v37 = vcombine.low %v438_v30, %v454_v32  ;;  %v504_v38 = vcombine.high %v438_v30, %v454_v32 }
 0x14a   :  { %v495_v39 = vrot.slane %v487_v35, %v2524_v28  ;;  %v502_v40 = vrot.slane %v488_v36, %v2524_v28  ;;  %v511_v41 = vrot.slane %v503_v37, %v2524_v28  ;;  %v518_v42 = vrot.slane %v504_v38, %v2524_v28 }
 0x14b   :  { %v146_v43 = vpop.permute.xlu1 %145  ;;  %v152_v44 = vpop.permute.xlu0 %151 }
 0x14c   :  { %v2192_v45 = vcombine.low %v495_v39, %v502_v40  ;;  %v2194_v46 = vcombine.high %v495_v39, %v502_v40  ;;  %v2196_v47 = vcombine.low %v511_v41, %v518_v42  ;;  %v2198_v48 = vcombine.high %v511_v41, %v518_v42 }
 0x14d   :  { %v219_v49 = vcombine.low %v140_v34, %v152_v44  ;;  %v220_v50 = vcombine.high %v140_v34, %v152_v44 }
 0x14e   :  { %v746_v51 = vrot.slane %v2192_v45, %v2522_v21  ;;  %v762_v52 = vrot.slane %v2194_v46, %v2522_v21  ;;  %v778_v55 = vrot.slane %v2196_v47, %v2522_v21  ;;  %v794_v56 = vrot.slane %v2198_v48, %v2522_v21 }
 0x14f   :  { %v158_v53 = vpop.permute.xlu1 %157  ;;  %v122_v54 = vpop.permute.xlu0 %121  ;;  %v227_v63 = vrot.slane %v219_v49, %v2522_v21  ;;  %v234_v0 = vrot.slane %v220_v50, %v2522_v21 }
 0x150   :  { %v235_v57 = vcombine.low %v146_v43, %v158_v53  ;;  %v236_v58 = vcombine.high %v146_v43, %v158_v53  ;;  %v811_v59 = vcombine.low %v746_v51, %v762_v52  ;;  %v812_v60 = vcombine.high %v746_v51, %v762_v52 }
 0x151   :  { %v843_v61 = vcombine.low %v778_v55, %v794_v56  ;;  %v844_v62 = vcombine.high %v778_v55, %v794_v56 }
 0x152   :  { %v243_v1 = vrot.slane %v235_v57, %v2522_v21  ;;  %v250_v2 = vrot.slane %v236_v58, %v2522_v21  ;;  %v819_v5 = vrot.slane %v811_v59, %v2524_v28  ;;  %v826_v7 = vrot.slane %v812_v60, %v2524_v28 }
 0x153   :  { %v128_v3 = vpop.permute.xlu1 %127  ;;  %v134_v4 = vpop.permute.xlu0 %133  ;;  %v851_v6 = vrot.slane %v843_v61, %v2524_v28  ;;  %v858_v9 = vrot.slane %v844_v62, %v2524_v28 }
 0x154   :  { %v283_v11 = vcombine.low %v227_v63, %v243_v1  ;;  %v284_v12 = vcombine.high %v227_v63, %v243_v1  ;;  %v299_v13 = vcombine.low %v234_v0, %v250_v2  ;;  %v300_v14 = vcombine.high %v234_v0, %v250_v2 }
 0x155   :  { %v187_v15 = vcombine.low %v2510_v10, %v128_v3  ;;  %v188_v16 = vcombine.high %v2510_v10, %v128_v3  ;;  %v203_v17 = vcombine.low %v122_v54, %v134_v4  ;;  %v204_v18 = vcombine.high %v122_v54, %v134_v4 }
 0x156   :  { %v291_v19 = vrot.slane %v283_v11, %v2524_v28  ;;  %v298_v20 = vrot.slane %v284_v12, %v2524_v28  ;;  %v307_v22 = vrot.slane %v299_v13, %v2524_v28  ;;  %v314_v23 = vrot.slane %v300_v14, %v2524_v28 }
 0x157   :  { %v195_v24 = vrot.slane %v187_v15, %v2522_v21  ;;  %v202_v25 = vrot.slane %v188_v16, %v2522_v21  ;;  %v211_v26 = vrot.slane %v203_v17, %v2522_v21  ;;  %v218_v27 = vrot.slane %v204_v18, %v2522_v21  ;;  %v136_v38 = vpop.permute.xlu1 %135  ;;  %v130_v43 = vpop.permute.xlu0 %129 }
 0x158   :  { %v2184_v29 = vcombine.low %v291_v19, %v298_v20  ;;  %v2186_v30 = vcombine.high %v291_v19, %v298_v20  ;;  %v2188_v31 = vcombine.low %v307_v22, %v314_v23  ;;  %v2190_v32 = vcombine.high %v307_v22, %v314_v23 }
 0x159   :  { %v251_v34 = vcombine.low %v195_v24, %v211_v26  ;;  %v252_v35 = vcombine.high %v195_v24, %v211_v26  ;;  %v267_v36 = vcombine.low %v202_v25, %v218_v27  ;;  %v268_v37 = vcombine.high %v202_v25, %v218_v27 }
 0x15a   :  { %v2559_v39 = vrot.slane %v2184_v29, %v2522_v21  ;;  %v2562_v40 = vrot.slane %v2186_v30, %v2522_v21  ;;  %v2565_v41 = vrot.slane %v2188_v31, %v2522_v21  ;;  %v2568_v42 = vrot.slane %v2190_v32, %v2522_v21 }
 0x15b   :  { %v259_v44 = vrot.slane %v251_v34, %v2524_v28  ;;  %v266_v45 = vrot.slane %v252_v35, %v2524_v28  ;;  %v275_v46 = vrot.slane %v267_v36, %v2524_v28  ;;  %v282_v47 = vrot.slane %v268_v37, %v2524_v28 }
 0x15c   :  { %v863_v48 = vcombine.low %v819_v5, %v851_v6  ;;  %v864_v49 = vcombine.high %v819_v5, %v851_v6  ;;  %v407_v50 = vcombine.low %v2530_v33, %v136_v38  ;;  %v408_v51 = vcombine.high %v2530_v33, %v136_v38 }
 0x15d   :  { %v391_v52 = vcombine.low %v2504_v8, %v130_v43  ;;  %v392_v53 = vcombine.high %v2504_v8, %v130_v43  ;;  %v675_v54 = vcombine.low %v2559_v39, %v2562_v40  ;;  %v707_v55 = vcombine.low %v2565_v41, %v2568_v42 }
 0x15e   :  { %2289 = vmatprep.subr.msk.mxu1 %vm1005_vm1, %v863_v48  ;;  %2296 = vmatprep.subr.msk.mxu0 %vm1005_vm1, %v864_v49  ;;  %v415_v56 = vrot.slane %v407_v50, %v2522_v21  ;;  %v422_v57 = vrot.slane %v408_v51, %v2522_v21  ;;  %v2586_v58 = vcombine.low %v826_v7, %v858_v9 }
 0x15f   :  { %2290 = vmatpush3.xpose.msk.msra.mxu1 %vm1005_vm1, %v863_v48  ;;  %2297 = vmatpush3.xpose.msk.msra.mxu0 %vm1005_vm1, %v864_v49  ;;  %v399_v33 = vrot.slane %v391_v52, %v2522_v21  ;;  %v406_v59 = vrot.slane %v392_v53, %v2522_v21  ;;  %v683_v60 = vrot.slane %v675_v54, %v2524_v28 }
 0x160   :  { %v715_v61 = vrot.slane %v707_v55, %v2524_v28  ;;  %v866_v62 = vcombine.high %v826_v7, %v858_v9  ;;  %v2183_v63 = vcombine.low %v259_v44, %v266_v45  ;;  %v2185_v0 = vcombine.high %v259_v44, %v266_v45 }
 0x161   :  { %v455_v1 = vcombine.low %v399_v33, %v415_v56  ;;  %v456_v2 = vcombine.high %v399_v33, %v415_v56  ;;  %v471_v3 = vcombine.low %v406_v59, %v422_v57  ;;  %v472_v4 = vcombine.high %v406_v59, %v422_v57  ;;  %v1004_v59 = vld [vmem:[%s2843_s5 + $0x8] sm:$0xff] }
 0x162   :  { %v727_v5 = vcombine.low %v683_v60, %v715_v61  ;;  %v728_v6 = vcombine.high %v683_v60, %v715_v61  ;;  %v603_v11 = vrot.slane %v2183_v63, %v2522_v21  ;;  %v619_v12 = vrot.slane %v2185_v0, %v2522_v21 }
 0x163   :  { %v463_v13 = vrot.slane %v455_v1, %v2524_v28  ;;  %v470_v14 = vrot.slane %v456_v2, %v2524_v28  ;;  %v479_v15 = vrot.slane %v471_v3, %v2524_v28  ;;  %v486_v7 = vrot.slane %v472_v4, %v2524_v28 }
 0x164   :  { %2291 = vmatprep.subr.msk.mxu1 %vm1005_vm1, %v727_v5  ;;  %2298 = vmatprep.subr.msk.mxu0 %vm1005_vm1, %v728_v6  ;;  %v2187_v9 = vcombine.low %v275_v46, %v282_v47  ;;  %v2189_v16 = vcombine.high %v275_v46, %v282_v47  ;;  %v659_v17 = vcombine.low %v603_v11, %v619_v12 }
 0x165   :  { %v2191_v18 = vcombine.low %v463_v13, %v470_v14  ;;  %v2193_v19 = vcombine.high %v463_v13, %v470_v14  ;;  %v2195_v20 = vcombine.low %v479_v15, %v486_v7  ;;  %v2197_v22 = vcombine.high %v479_v15, %v486_v7  ;;  %2292 = vmatpush3.xpose.msk.msra.mxu1 %vm1005_vm1, %v727_v5 }
 0x166   :  { %2299 = vmatpush3.xpose.msk.msra.mxu0 %vm1005_vm1, %v728_v6  ;;  %2303 = vmatprep.subr.msk.mxu1 %vm1005_vm1, %v2586_v58  ;;  %v635_v23 = vrot.slane %v2187_v9, %v2522_v21  ;;  %v651_v24 = vrot.slane %v2189_v16, %v2522_v21  ;;  %v660_v25 = vcombine.high %v603_v11, %v619_v12 }
 0x167   :  { %v739_v26 = vrot.slane %v2191_v18, %v2522_v21  ;;  %v755_v27 = vrot.slane %v2193_v19, %v2522_v21  ;;  %v771_v29 = vrot.slane %v2195_v20, %v2522_v21  ;;  %v787_v30 = vrot.slane %v2197_v22, %v2522_v21  ;;  %2310 = vmatprep.subr.msk.mxu0 %vm1005_vm1, %v866_v62 }
 0x168   :  { %v667_v31 = vrot.slane %v659_v17, %v2524_v28  ;;  %v691_v32 = vcombine.low %v635_v23, %v651_v24  ;;  %v692_v34 = vcombine.high %v635_v23, %v651_v24  ;;  %v676_v35 = vcombine.high %v2559_v39, %v2562_v40 }
 0x169   :  { %v795_v36 = vcombine.low %v739_v26, %v755_v27  ;;  %v827_v37 = vcombine.low %v771_v29, %v787_v30  ;;  %v708_v44 = vcombine.high %v2565_v41, %v2568_v42  ;;  %v674_v47 = vrot.slane %v660_v25, %v2524_v28 }
 0x16a   :  { %v699_v38 = vrot.slane %v691_v32, %v2524_v28  ;;  %v690_v43 = vrot.slane %v676_v35, %v2524_v28  ;;  %v706_v48 = vrot.slane %v692_v34, %v2524_v28  ;;  %v796_v40 = vcombine.high %v739_v26, %v755_v27 }
 0x16b   :  { %v803_v45 = vrot.slane %v795_v36, %v2524_v28  ;;  %v835_v46 = vrot.slane %v827_v37, %v2524_v28  ;;  %v722_v39 = vrot.slane %v708_v44, %v2524_v28  ;;  %v828_v51 = vcombine.high %v771_v29, %v787_v30 }
 0x16c   :  { %v723_v49 = vcombine.low %v667_v31, %v699_v38  ;;  %v724_v50 = vcombine.high %v667_v31, %v699_v38  ;;  %v725_v42 = vcombine.low %v674_v47, %v706_v48  ;;  %v726_v55 = vcombine.high %v674_v47, %v706_v48 }
 0x16d   :  { %v859_v52 = vcombine.low %v803_v45, %v835_v46  ;;  %v860_v53 = vcombine.high %v803_v45, %v835_v46  ;;  %v729_v41 = vcombine.low %v690_v43, %v722_v39  ;;  %v730_v54 = vcombine.high %v690_v43, %v722_v39 }
 0x16e   :  { %2293 = vmatprep.mubr.msk.f32.mxu1 %vm1005_vm1, %v723_v49  ;;  %2300 = vmatprep.mubr.msk.f32.mxu0 %vm1005_vm1, %v724_v50  ;;  %v810_v56 = vrot.slane %v796_v40, %v2524_v28  ;;  %v842_v57 = vrot.slane %v828_v51, %v2524_v28 }
 0x16f   :  { %2294 = vmatmul.mubr.msk.f32.vlgmr.msra.gmra.mxu1 %vm1005_vm1, %v859_v52  ;;  %2301 = vmatmul.mubr.msk.f32.vlgmr.msra.gmra.mxu0 %vm1005_vm1, %v860_v53 }
 0x170   :  { %2304 = vmatpush3.xpose.msk.msra.mxu1 %vm1005_vm1, %v2586_v58  ;;  %2311 = vmatpush3.xpose.msk.msra.mxu0 %vm1005_vm1, %v866_v62  ;;  %v861_v58 = vcombine.low %v810_v56, %v842_v57  ;;  %v862_v33 = vcombine.high %v810_v56, %v842_v57  ;;  %v1003_v62 = vld [vmem:[%s2843_s5] sm:$0xff]  ;;  %s2437_s5 = smov 64  }
 0x171   :  { %2305 = vmatprep.subr.msk.mxu1 %vm1005_vm1, %v729_v41  ;;  %2307 = vmatprep.mubr.msk.f32.mxu1 %vm1005_vm1, %v725_v42 }
 0x172   :  { %2312 = vmatprep.subr.msk.mxu0 %vm1005_vm1, %v730_v54  ;;  %2314 = vmatprep.mubr.msk.f32.mxu0 %vm1005_vm1, %v726_v55 }
 0x174   :  { %2306 = vmatpush3.xpose.msk.msra.mxu1 %vm1005_vm1, %v729_v41  ;;  %2313 = vmatpush3.xpose.msk.msra.mxu0 %vm1005_vm1, %v730_v54 }
 0x177   :  { %2308 = vmatmul.mubr.msk.f32.vlgmr.msra.gmra.mxu1 %vm1005_vm1, %v861_v58  ;;  %2315 = vmatmul.mubr.msk.f32.vlgmr.msra.gmra.mxu0 %vm1005_vm1, %v862_v33 }
 0x22f   :  { %v2295_v60 = vpop.f32.mrf.mxu1  ;;  %v2302_v61 = vpop.f32.mrf.mxu0 }
 0x230   :  { %v1090_v63 = vadd.f32 %v2295_v60, %v1004_v59  ;;  %v1177_v6 = vadd.f32 %v2302_v61, %v1004_v59 }
 0x231   :  { %v1084_v0 = vpop.f32.mrf.mxu1  ;;  %v1171_v1 = vpop.f32.mrf.mxu0 }
 0x232   :  { %v1085_v2 = vadd.f32 %v1084_v0, %v1003_v62  ;;  %v1358_v3 = vsel %vm1354_vm2, %v1090_v63, -inf  ;;  %v1172_v4 = vadd.f32 %v1171_v1, %v1003_v62  ;;  %v1364_v14 = vsel %vm1354_vm2, %v1177_v6, -inf }
 0x233   :  { %1359 = vmax.xlane.f32.xlu1 %v1358_v3 }
 0x234   :  { %v1355_v5 = vsel %vm1354_vm2, %v1085_v2, -inf  ;;  %v1361_v11 = vsel %vm1354_vm2, %v1172_v4, -inf }
 0x235   :  { %1356 = vmax.xlane.f32.xlu0 %v1355_v5 }
 0x237   :  { %v2309_v12 = vpop.f32.mrf.mxu1  ;;  %v2316_v15 = vpop.f32.mrf.mxu0 }
 0x238   :  { %v2651_v13 = vadd.f32 %v2309_v12, %v1004_v59  ;;  %v2654_v7 = vadd.f32 %v2316_v15, %v1004_v59 }
 0x239   :  { %1362 = vmax.xlane.f32.xlu0 %v1361_v11  ;;  %v1258_v17 = vpop.f32.mrf.mxu1  ;;  %v1345_v19 = vpop.f32.mrf.mxu0 }
 0x23a   :  { %v1370_v9 = vsel %vm1354_vm2, %v2651_v13, -inf  ;;  %v1376_v16 = vsel %vm1354_vm2, %v2654_v7, -inf  ;;  %v2667_v18 = vadd.f32 %v1258_v17, %v1003_v62  ;;  %v2669_v20 = vadd.f32 %v1345_v19, %v1003_v62 }
 0x23c   :  { %v1367_v22 = vsel %vm1354_vm2, %v2667_v18, -inf  ;;  %v1373_v23 = vsel %vm1354_vm2, %v2669_v20, -inf }
 0x23d   :  { %1365 = vmax.xlane.f32.xlu0 %v1364_v14 }
 0x241   :  { %1371 = vmax.xlane.f32.xlu0 %v1370_v9 }
 0x244   :  { %165 = vrot.lane.b32.xlu1 %v2504_v8, %s2437_s5 }
 0x245   :  { %1377 = vmax.xlane.f32.xlu0 %v1376_v16 }
 0x248   :  { %177 = vrot.lane.b32.xlu1 %v2504_v8, %s2438_s19 }
 0x24c   :  { %183 = vrot.lane.b32.xlu1 %v2504_v8, %s2439_s20 }
 0x250   :  { %163 = vrot.lane.b32.xlu1 %v2510_v10, %s2437_s5 }
 0x254   :  { %169 = vrot.lane.b32.xlu1 %v2510_v10, %s2440_s21 }
 0x25b   :  { %171 = vrot.lane.b32.xlu0 %v2504_v8, %s2440_s21 }
 0x278   :  { %1368 = vmax.xlane.f32.xlu1 %v1367_v22 }
 0x27c   :  { %1374 = vmax.xlane.f32.xlu1 %v1373_v23 }
 0x28d   :  { %175 = vrot.lane.b32.xlu1 %v2510_v10, %s2438_s19 }
 0x2bc   :  { %v1360_v24 = vpop.xlane.xlu1 %1359 }
 0x2bd   :  { %v1380_v25 = vsub.f32 %v1090_v63, %v1360_v24 }
 0x2be   :  { %v1357_v26 = vpop.xlane.xlu0 %1356 }
 0x2bf   :  { %v1389_v8 = vmul.f32 1.442695, %v1380_v25  ;;  %v1379_v27 = vsub.f32 %v1085_v2, %v1357_v26 }
 0x2c0   :  { %v166_v34 = vpop.permute.xlu1 %165 }
 0x2c1   :  { %2374 = vpow2.f32 %v1389_v8  ;;  %v1387_v29 = vmul.f32 1.442695, %v1379_v27 }
 0x2c2   :  { %v1363_v30 = vpop.xlane.xlu0 %1362 }
 0x2c3   :  { %2376 = vpow2.f32 %v1387_v29  ;;  %v1381_v31 = vsub.f32 %v1172_v4, %v1363_v30 }
 0x2c4   :  { %v178_v43 = vpop.permute.xlu1 %177 }
 0x2c5   :  { %v1391_v32 = vmul.f32 1.442695, %v1381_v31  ;;  %v527_v48 = vcombine.low %v166_v34, %v178_v43  ;;  %v528_v49 = vcombine.high %v166_v34, %v178_v43 }
 0x2c6   :  { %v1366_v35 = vpop.xlane.xlu0 %1365 }
 0x2c7   :  { %2378 = vpow2.f32 %v1391_v32  ;;  %v1382_v36 = vsub.f32 %v1177_v6, %v1366_v35  ;;  %v535_v41 = vrot.slane %v527_v48, %v2522_v21  ;;  %v542_v42 = vrot.slane %v528_v49, %v2522_v21 }
 0x2c8   :  { %v184_v39 = vpop.permute.xlu1 %183 }
 0x2c9   :  { %v1393_v37 = vmul.f32 1.442695, %v1382_v36 }
 0x2ca   :  { %v1372_v38 = vpop.xlane.xlu0 %1371 }
 0x2cb   :  { %2380 = vpow2.f32 %v1393_v37  ;;  %v1384_v29 = vsub.f32 %v2651_v13, %v1372_v38 }
 0x2cc   :  { %v164_v31 = vpop.permute.xlu1 %163 }
 0x2cd   :  { %v1397_v30 = vmul.f32 1.442695, %v1384_v29 }
 0x2ce   :  { %v2676_v44 = vpop.eup %2374  ;;  %v2678_v45 = vpop.xlane.xlu0 %1377 }
 0x2cf   :  { %v1406_v46 = vsel %vm1354_vm2, %v2676_v44, 0.0  ;;  %2382 = vpow2.f32 %v1397_v30  ;;  %v1386_v36 = vsub.f32 %v2654_v7, %v2678_v45 }
 0x2d0   :  { %v2682_v47 = vpop.eup %2376  ;;  %1407 = vadd.xlane.f32.xlu0 %v1406_v46  ;;  %v170_v32 = vpop.permute.xlu1 %169 }
 0x2d1   :  { %v1403_v50 = vsel %vm1354_vm2, %v2682_v47, 0.0 }
 0x2d2   :  { %1404 = vadd.xlane.f32.xlu1 %v1403_v50  ;;  %v172_v40 = vpop.permute.xlu0 %171 }
 0x2d3   :  { %v543_v51 = vcombine.low %v172_v40, %v184_v39  ;;  %v544_v52 = vcombine.high %v172_v40, %v184_v39 }
 0x2d4   :  { %v2686_v53 = vpop.eup %2378 }
 0x2d5   :  { %v551_v54 = vrot.slane %v543_v51, %v2522_v21  ;;  %v558_v55 = vrot.slane %v544_v52, %v2522_v21  ;;  %v1409_v56 = vsel %vm1354_vm2, %v2686_v53, 0.0 }
 0x2d6   :  { %1410 = vadd.xlane.f32.xlu1 %v1409_v56 }
 0x2d7   :  { %v559_v57 = vcombine.low %v535_v41, %v551_v54  ;;  %v560_v58 = vcombine.high %v535_v41, %v551_v54  ;;  %v575_v33 = vcombine.low %v542_v42, %v558_v55  ;;  %v576_v59 = vcombine.high %v542_v42, %v558_v55 }
 0x2d8   :  { %v2694_v60 = vpop.eup %2380 }
 0x2d9   :  { %v567_v61 = vrot.slane %v559_v57, %v2524_v28  ;;  %v574_v62 = vrot.slane %v560_v58, %v2524_v28  ;;  %v583_v63 = vrot.slane %v575_v33, %v2524_v28  ;;  %v590_v0 = vrot.slane %v576_v59, %v2524_v28 }
 0x2da   :  { %v1412_v1 = vsel %vm1354_vm2, %v2694_v60, 0.0 }
 0x2db   :  { %v935_v2 = vcombine.low %v567_v61, %v574_v62  ;;  %v2201_v3 = vcombine.high %v567_v61, %v574_v62  ;;  %v951_v4 = vcombine.low %v583_v63, %v590_v0  ;;  %v2202_v5 = vcombine.high %v583_v63, %v590_v0  ;;  %1413 = vadd.xlane.f32.xlu0 %v1412_v1 }
 0x2dc   :  { %v2723_v48 = vpop.eup %2382 }
 0x2dd   :  { %v942_v6 = vrot.slane %v935_v2, %v2522_v21  ;;  %v950_v11 = vrot.slane %v2201_v3, %v2522_v21  ;;  %v958_v12 = vrot.slane %v951_v4, %v2522_v21  ;;  %v966_v14 = vrot.slane %v2202_v5, %v2522_v21 }
 0x2de   :  { %v1418_v13 = vsel %vm1354_vm2, %v2723_v48, 0.0 }
 0x2df   :  { %v967_v15 = vcombine.low %v942_v6, %v950_v11  ;;  %v983_v9 = vcombine.low %v958_v12, %v966_v14  ;;  %v968_v16 = vcombine.high %v942_v6, %v950_v11  ;;  %v984_v17 = vcombine.high %v958_v12, %v966_v14 }
 0x2e1   :  { %v975_v19 = vrot.slane %v967_v15, %v2524_v28  ;;  %v991_v22 = vrot.slane %v983_v9, %v2524_v28  ;;  %v982_v23 = vrot.slane %v968_v16, %v2524_v28  ;;  %v998_v24 = vrot.slane %v984_v17, %v2524_v28 }
 0x2e3   :  { %v999_v25 = vcombine.low %v975_v19, %v991_v22  ;;  %v2710_v26 = vcombine.high %v975_v19, %v991_v22  ;;  %v2712_v8 = vcombine.low %v982_v23, %v998_v24  ;;  %v2714_v27 = vcombine.high %v982_v23, %v998_v24 }
 0x2e5   :  { %2317 = vmatprep.subr.mxu1 %v999_v25 }
 0x2e6   :  { %2318 = vmatpush3.msra.mxu1 %v999_v25 }
 0x2e7   :  { %181 = vrot.lane.b32.xlu1 %v2510_v10, %s2439_s20  ;;  %v1401_v10 = vmul.f32 1.442695, %v1386_v36 }
 0x301   :  { %v1369_v34 = vpop.xlane.xlu1 %1368 }
 0x302   :  { %v1383_v35 = vsub.f32 %v2667_v18, %v1369_v34 }
 0x304   :  { %v1395_v37 = vmul.f32 1.442695, %v1383_v35 }
 0x305   :  { %v1375_v43 = vpop.xlane.xlu1 %1374 }
 0x306   :  { %2384 = vpow2.f32 %v1395_v37  ;;  %v1385_v46 = vsub.f32 %v2669_v20, %v1375_v43 }
 0x308   :  { %v1399_v49 = vmul.f32 1.442695, %v1385_v46 }
 0x309   :  { %v176_v39 = vpop.permute.xlu1 %175 }
 0x30a   :  { %2386 = vpow2.f32 %v1399_v49  ;;  %v323_v52 = vcombine.low %v164_v31, %v176_v39  ;;  %v324_v41 = vcombine.high %v164_v31, %v176_v39 }
 0x30b   :  { %1419 = vadd.xlane.f32.xlu1 %v1418_v13  ;;  %2388 = vpow2.f32 %v1401_v10 }
 0x30c   :  { %v331_v57 = vrot.slane %v323_v52, %v2522_v21  ;;  %v338_v58 = vrot.slane %v324_v41, %v2522_v21 }
 0x313   :  { %v2727_v38 = vpop.eup %2384 }
 0x314   :  { %v1415_v7 = vsel %vm1354_vm2, %v2727_v38, 0.0 }
 0x315   :  { %1416 = vadd.xlane.f32.xlu0 %v1415_v7 }
 0x317   :  { %v2731_v18 = vpop.eup %2386 }
 0x318   :  { %v1421_v20 = vsel %vm1354_vm2, %v2731_v18, 0.0  ;;  %v2735_v45 = vpop.eup %2388 }
 0x319   :  { %1422 = vadd.xlane.f32.xlu0 %v1421_v20  ;;  %v1424_v50 = vsel %vm1354_vm2, %v2735_v45, 0.0 }
 0x31d   :  { %1425 = vadd.xlane.f32.xlu0 %v1424_v50 }
 0x359   :  { %v1408_v42 = vpop.xlane.xlu0 %1407 }
 0x35b   :  { %v1405_v40 = vpop.xlane.xlu1 %1404 }
 0x35c   :  { %2390 = vrcp.f32 %v1405_v40 }
 0x35d   :  { %2392 = vrcp.f32 %v1408_v42 }
 0x35f   :  { %v1411_v51 = vpop.xlane.xlu1 %1410 }
 0x360   :  { %2394 = vrcp.f32 %v1411_v51 }
 0x363   :  { %v182_v54 = vpop.permute.xlu1 %181 }
 0x364   :  { %v339_v55 = vcombine.low %v170_v32, %v182_v54  ;;  %v340_v56 = vcombine.high %v170_v32, %v182_v54  ;;  %v1414_v61 = vpop.xlane.xlu0 %1413 }
 0x365   :  { %2396 = vrcp.f32 %v1414_v61 }
 0x366   :  { %v347_v33 = vrot.slane %v339_v55, %v2522_v21  ;;  %v354_v59 = vrot.slane %v340_v56, %v2522_v21 }
 0x368   :  { %v355_v62 = vcombine.low %v331_v57, %v347_v33  ;;  %v356_v63 = vcombine.high %v331_v57, %v347_v33  ;;  %v371_v0 = vcombine.low %v338_v58, %v354_v59  ;;  %v372_v1 = vcombine.high %v338_v58, %v354_v59 }
 0x369   :  { %v2391_v2 = vpop.eup %2390 }
 0x36a   :  { %v363_v3 = vrot.slane %v355_v62, %v2524_v28  ;;  %v370_v4 = vrot.slane %v356_v63, %v2524_v28  ;;  %v379_v5 = vrot.slane %v371_v0, %v2524_v28  ;;  %v386_v6 = vrot.slane %v372_v1, %v2524_v28  ;;  %v2393_v29 = vpop.eup %2392 }
 0x36b   :  { %v1428_v11 = vmul.f32 %v2391_v2, %v2682_v47  ;;  %v1430_v36 = vmul.f32 %v2393_v29, %v2676_v44 }
 0x36c   :  { %v867_v12 = vcombine.low %v363_v3, %v370_v4  ;;  %v2199_v14 = vcombine.high %v363_v3, %v370_v4  ;;  %v883_v15 = vcombine.low %v379_v5, %v386_v6  ;;  %v2200_v9 = vcombine.high %v379_v5, %v386_v6 }
 0x36d   :  { %2321 = vmatprep.mubr.msk.f32.mxu1 %vm1354_vm2, %v1428_v11  ;;  %v2395_v30 = vpop.eup %2394 }
 0x36e   :  { %v874_v16 = vrot.slane %v867_v12, %v2522_v21  ;;  %v882_v17 = vrot.slane %v2199_v14, %v2522_v21  ;;  %v890_v19 = vrot.slane %v883_v15, %v2522_v21  ;;  %v898_v22 = vrot.slane %v2200_v9, %v2522_v21 }
 0x36f   :  { %v1432_v37 = vmul.f32 %v2395_v30, %v2686_v53 }
 0x370   :  { %v899_v23 = vcombine.low %v874_v16, %v882_v17  ;;  %v915_v24 = vcombine.low %v890_v19, %v898_v22  ;;  %v900_v32 = vcombine.high %v874_v16, %v882_v17  ;;  %v916_v34 = vcombine.high %v890_v19, %v898_v22 }
 0x372   :  { %v907_v25 = vrot.slane %v899_v23, %v2524_v28  ;;  %v923_v47 = vrot.slane %v915_v24, %v2524_v28  ;;  %v2397_v35 = vpop.eup %2396  ;;  %v914_v46 = vrot.slane %v900_v32, %v2524_v28  ;;  %v930_v10 = vrot.slane %v916_v34, %v2524_v28 }
 0x373   :  { %v1434_v49 = vmul.f32 %v2397_v35, %v2694_v60 }
 0x374   :  { %v931_v31 = vcombine.low %v907_v25, %v923_v47  ;;  %v932_v43 = vcombine.high %v907_v25, %v923_v47  ;;  %v933_v44 = vcombine.low %v914_v46, %v930_v10  ;;  %v934_v40 = vcombine.high %v914_v46, %v930_v10 }
 0x376   :  { %2319 = vmatprep.subr.mxu1 %v931_v31 }
 0x377   :  { %2320 = vmatpush3.msra.mxu1 %v931_v31 }
 0x378   :  { %2322 = vmatmul.mubr.msk.f32.vlgmr.msra.gmra.mxu1 %vm1354_vm2, %v1430_v36  ;;  %2324 = vmatprep.subr.mxu1 %v2710_v26 }
 0x379   :  { %2325 = vmatpush3.msra.mxu1 %v2710_v26  ;;  %2328 = vmatprep.mubr.msk.f32.mxu1 %vm1354_vm2, %v1432_v37 }
 0x37a   :  { %2326 = vmatprep.subr.mxu1 %v932_v43 }
 0x37b   :  { %2327 = vmatpush3.msra.mxu1 %v932_v43  ;;  %v2073_v43 = vld [vmem:[%s2841_s3 + $0x18] sm:$0xff] }
 0x37c   :  { %2329 = vmatmul.mubr.msk.f32.vlgmr.msra.gmra.mxu1 %vm1354_vm2, %v1434_v49  ;;  %2331 = vmatprep.subr.mxu1 %v2712_v8 }
 0x37d   :  { %2332 = vmatpush3.msra.mxu1 %v2712_v8  ;;  %2345 = vmatprep.subr.mxu0 %v2073_v43 }
 0x37e   :  { %2333 = vmatprep.subr.mxu1 %v933_v44  ;;  %2346 = vmatpush3.msra.mxu0 %v2073_v43 }
 0x37f   :  { %2334 = vmatpush3.msra.mxu1 %v933_v44 }
 0x380   :  { %2338 = vmatprep.subr.mxu1 %v2714_v27 }
 0x394   :  { %v1420_v53 = vpop.xlane.xlu1 %1419 }
 0x395   :  { %2398 = vrcp.f32 %v1420_v53 }
 0x39e   :  { %v1417_v26 = vpop.xlane.xlu0 %1416 }
 0x39f   :  { %2400 = vrcp.f32 %v1417_v26 }
 0x3a2   :  { %v1423_v13 = vpop.xlane.xlu0 %1422  ;;  %v2399_v60 = vpop.eup %2398 }
 0x3a3   :  { %2402 = vrcp.f32 %v1423_v13  ;;  %v1438_v39 = vmul.f32 %v2399_v60, %v2723_v48 }
 0x3a6   :  { %v1426_v7 = vpop.xlane.xlu0 %1425 }
 0x3a7   :  { %2404 = vrcp.f32 %v1426_v7 }
 0x3ac   :  { %v2401_v20 = vpop.eup %2400 }
 0x3ad   :  { %v1436_v50 = vmul.f32 %v2401_v20, %v2727_v38 }
 0x3af   :  { %2335 = vmatprep.mubr.msk.f32.mxu1 %vm1354_vm2, %v1436_v50 }
 0x3b0   :  { %v2403_v8 = vpop.eup %2402  ;;  %2336 = vmatmul.mubr.msk.f32.vlgmr.msra.gmra.mxu1 %vm1354_vm2, %v1438_v39 }
 0x3b1   :  { %2339 = vmatpush3.msra.mxu1 %v2714_v27  ;;  %v1440_v51 = vmul.f32 %v2403_v8, %v2731_v18 }
 0x3b2   :  { %2340 = vmatprep.subr.mxu1 %v934_v40 }
 0x3b3   :  { %2341 = vmatpush3.msra.mxu1 %v934_v40  ;;  %2342 = vmatprep.mubr.msk.f32.mxu1 %vm1354_vm2, %v1440_v51 }
 0x3b4   :  { %v2405_v52 = vpop.eup %2404 }
 0x3b5   :  { %v1442_v41 = vmul.f32 %v2405_v52, %v2735_v45 }
 0x3b7   :  { %2343 = vmatmul.mubr.msk.f32.vlgmr.msra.gmra.mxu1 %vm1354_vm2, %v1442_v41  ;;  %v2072_v41 = vld [vmem:[%s2841_s3 + $0x10] sm:$0xff] }
 0x3b8   :  { %2347 = vmatprep.subr.mxu0 %v2072_v41 }
 0x3b9   :  { %2348 = vmatpush3.msra.mxu0 %v2072_v41 }
 0x438   :  { %v2323_v48 = vpop.f32.mrf.mxu1 }
 0x43a   :  { %v1515_v38 = vpop.f32.mrf.mxu1 }
 0x43c   :  { %v2330_v42 = vpop.f32.mrf.mxu1 }
 0x43e   :  { %v1596_v54 = vpop.f32.mrf.mxu1 }
 0x470   :  { %v2337_v55 = vpop.f32.mrf.mxu1 }
 0x471   :  { %v1835_v56 = vcombine.low %v2323_v48, %v2337_v55  ;;  %v1836_v57 = vcombine.high %v2323_v48, %v2337_v55  ;;  %v2071_v48 = vld [vmem:[%s2841_s3 + $0x8] sm:$0xff] }
 0x472   :  { %v1677_v58 = vpop.f32.mrf.mxu1  ;;  %2349 = vmatprep.subr.mxu0 %v2071_v48 }
 0x473   :  { %v1843_v59 = vrot.slane %v1835_v56, %v2522_v21  ;;  %v1850_v61 = vrot.slane %v1836_v57, %v2522_v21  ;;  %v1767_v62 = vcombine.low %v1515_v38, %v1677_v58  ;;  %v1768_v63 = vcombine.high %v1515_v38, %v1677_v58  ;;  %2350 = vmatpush3.msra.mxu0 %v2071_v48 }
 0x475   :  { %v1775_v12 = vrot.slane %v1767_v62, %v2522_v21  ;;  %v1782_v14 = vrot.slane %v1768_v63, %v2522_v21  ;;  %v2070_v62 = vld [vmem:[%s2841_s3] sm:$0xff] }
 0x476   :  { %2351 = vmatprep.subr.mxu0 %v2070_v62 }
 0x477   :  { %v2344_v27 = vpop.f32.mrf.mxu1  ;;  %2352 = vmatpush3.msra.mxu0 %v2070_v62 }
 0x478   :  { %v1851_v33 = vcombine.low %v2330_v42, %v2344_v27  ;;  %v1852_v18 = vcombine.high %v2330_v42, %v2344_v27 }
 0x479   :  { %v1758_v45 = vpop.f32.mrf.mxu1 }
 0x47a   :  { %v1859_v0 = vrot.slane %v1851_v33, %v2522_v21  ;;  %v1866_v1 = vrot.slane %v1852_v18, %v2522_v21  ;;  %v1783_v2 = vcombine.low %v1596_v54, %v1758_v45  ;;  %v1784_v3 = vcombine.high %v1596_v54, %v1758_v45 }
 0x47c   :  { %v1867_v4 = vcombine.low %v1843_v59, %v1859_v0  ;;  %v1868_v5 = vcombine.high %v1843_v59, %v1859_v0  ;;  %v1883_v6 = vcombine.low %v1850_v61, %v1866_v1  ;;  %v1884_v11 = vcombine.high %v1850_v61, %v1866_v1 }
 0x47d   :  { %v1791_v15 = vrot.slane %v1783_v2, %v2522_v21  ;;  %v1798_v9 = vrot.slane %v1784_v3, %v2522_v21 }
 0x47e   :  { %v1875_v16 = vrot.slane %v1867_v4, %v2524_v28  ;;  %v1882_v17 = vrot.slane %v1868_v5, %v2524_v28  ;;  %v1891_v19 = vrot.slane %v1883_v6, %v2524_v28  ;;  %v1898_v22 = vrot.slane %v1884_v11, %v2524_v28 }
 0x47f   :  { %v1799_v23 = vcombine.low %v1775_v12, %v1791_v15  ;;  %v1800_v24 = vcombine.high %v1775_v12, %v1791_v15  ;;  %v1815_v25 = vcombine.low %v1782_v14, %v1798_v9  ;;  %v1816_v47 = vcombine.high %v1782_v14, %v1798_v9 }
 0x480   :  { %v1971_v29 = vcombine.low %v1875_v16, %v1882_v17  ;;  %v2229_v30 = vcombine.high %v1875_v16, %v1882_v17  ;;  %v1987_v31 = vcombine.low %v1891_v19, %v1898_v22  ;;  %v2230_v32 = vcombine.high %v1891_v19, %v1898_v22 }
 0x481   :  { %v1807_v34 = vrot.slane %v1799_v23, %v2524_v28  ;;  %v1814_v35 = vrot.slane %v1800_v24, %v2524_v28  ;;  %v1823_v36 = vrot.slane %v1815_v25, %v2524_v28  ;;  %v1830_v37 = vrot.slane %v1816_v47, %v2524_v28  ;;  %v2231_v23 = vld [vmem:[%s2842_s4] ss:$0 sm:$0xff] }
 0x482   :  { %v1978_v46 = vrot.slane %v1971_v29, %v2522_v21  ;;  %v1986_v10 = vrot.slane %v2229_v30, %v2522_v21  ;;  %v1994_v49 = vrot.slane %v1987_v31, %v2522_v21  ;;  %v2002_v44 = vrot.slane %v2230_v32, %v2522_v21 }
 0x483   :  { %v1903_v53 = vcombine.low %v1807_v34, %v1814_v35  ;;  %v2227_v26 = vcombine.high %v1807_v34, %v1814_v35  ;;  %v1919_v13 = vcombine.low %v1823_v36, %v1830_v37  ;;  %v2228_v7 = vcombine.high %v1823_v36, %v1830_v37 }
 0x484   :  { %v2004_v60 = vcombine.high %v1978_v46, %v1986_v10  ;;  %v2020_v20 = vcombine.high %v1994_v49, %v2002_v44  ;;  %v2003_v50 = vcombine.low %v1978_v46, %v1986_v10  ;;  %v2019_v39 = vcombine.low %v1994_v49, %v2002_v44 }
 0x485   :  { %v1910_v8 = vrot.slane %v1903_v53, %v2522_v21  ;;  %v1918_v40 = vrot.slane %v2227_v26, %v2522_v21  ;;  %v1926_v51 = vrot.slane %v1919_v13, %v2522_v21  ;;  %v1934_v52 = vrot.slane %v2228_v7, %v2522_v21 }
 0x486   :  { %v2018_v38 = vrot.slane %v2004_v60, %v2524_v28  ;;  %v2034_v42 = vrot.slane %v2020_v20, %v2524_v28  ;;  %v2011_v54 = vrot.slane %v2003_v50, %v2524_v28  ;;  %v2027_v55 = vrot.slane %v2019_v39, %v2524_v28 }
 0x487   :  { %v1935_v56 = vcombine.low %v1910_v8, %v1918_v40  ;;  %v1951_v57 = vcombine.low %v1926_v51, %v1934_v52  ;;  %v1936_v21 = vcombine.high %v1910_v8, %v1918_v40  ;;  %v1952_v33 = vcombine.high %v1926_v51, %v1934_v52 }
 0x488   :  { %v2037_v58 = vcombine.low %v2018_v38, %v2034_v42  ;;  %v2036_v27 = vcombine.high %v2011_v54, %v2027_v55  ;;  %v2035_v18 = vcombine.low %v2011_v54, %v2027_v55  ;;  %v2038_v45 = vcombine.high %v2018_v38, %v2034_v42 }
 0x489   :  { %v1943_v59 = vrot.slane %v1935_v56, %v2524_v28  ;;  %v1959_v61 = vrot.slane %v1951_v57, %v2524_v28  ;;  %v1950_v1 = vrot.slane %v1936_v21, %v2524_v28  ;;  %v1966_v2 = vrot.slane %v1952_v33, %v2524_v28 }
 0x48a   :  { %2051 = vrot.lane.b32.xlu0 %v2037_v58, %s2441_s30  ;;  %2043 = vrot.lane.b32.xlu1 %v2036_v27, %s2442_s7 }
 0x48b   :  { %v1967_v63 = vcombine.low %v1943_v59, %v1959_v61  ;;  %v1968_v0 = vcombine.high %v1943_v59, %v1959_v61  ;;  %v1969_v3 = vcombine.low %v1950_v1, %v1966_v2  ;;  %v1970_v4 = vcombine.high %v1950_v1, %v1966_v2 }
 0x48e   :  { %2059 = vrot.lane.b32.xlu1 %v2038_v45, %s2443_s8  ;;  %2041 = vrot.lane.b32.xlu0 %v1968_v0, %s2442_s7 }
 0x492   :  { %2049 = vrot.lane.b32.xlu0 %v1969_v3, %s2441_s30 }
 0x496   :  { %2057 = vrot.lane.b32.xlu0 %v1970_v4, %s2443_s8 }
 0x4fc   :  { %v2052_v5 = vpop.permute.xlu0 %2051  ;;  %v2044_v11 = vpop.permute.xlu1 %2043 }
 0x4fd   :  { %v2064_v14 = vsel %vm1005_vm1, %v2035_v18, %v2044_v11 }
 0x4fe   :  { %v2066_v17 = vsel %vm1354_vm2, %v2064_v14, %v2052_v5 }
 0x500   :  { %v2042_v6 = vpop.permute.xlu0 %2041  ;;  %v2060_v15 = vpop.permute.xlu1 %2059 }
 0x501   :  { %v2063_v9 = vsel %vm1005_vm1, %v1967_v63, %v2042_v6  ;;  %v2069_v22 = vsel %vm2067_vm3, %v2066_v17, %v2060_v15 }
 0x504   :  { %v2050_v12 = vpop.permute.xlu0 %2049 }
 0x505   :  { %v2065_v28 = vsel %vm1354_vm2, %v2063_v9, %v2050_v12 }
 0x508   :  { %v2058_v16 = vpop.permute.xlu0 %2057 }
 0x509   :  { %v2068_v19 = vsel %vm2067_vm3, %v2065_v28, %v2058_v16 }
 0x50a   :  { %2353 = vmatprep.mubr.msk.f32.mxu0 %vm37_vm0, %v2068_v19 }
 0x50b   :  { %2354 = vmatmul.mubr.msk.f32.vlgmr.msra.gmra.mxu0 %vm37_vm0, %v2069_v22 }
 0x5cb   :  { %v2355_v24 = vpop.f32.mrf.mxu0 }
 0x5cc   :  { %v2159_v25 = vadd.f32 %v2355_v24, %v2231_v23 }
 0x5cd   :  { %v2153_v47 = vpop.f32.mrf.mxu0 }
 0x5ce   :  { %2163 = vst.msk [vmem:[#allocation2 + $0x8] sm:$0xff] %vm37_vm0, %v2159_v25  ;;  %v2154_v29 = vadd.f32 %v2231_v23, %v2153_v47 }
 0x5d0   :  { %2162 = vst.msk [vmem:[#allocation2] sm:$0xff] %vm37_vm0, %v2154_v29 }
 0x5d1   :  { %2417 = shalt.err (!%p2414_p4)
}
 0x5d2   :  { %s2445_s12 = smov 128  }
 0x5d3   :  { %2175 = dma.vmem_to_hbm [thread:$0]  %s2170_s11, 256, %s2844_s6, [#allocation3], %s2445_s12, %s2445_s12, %s2442_s7  }
 0x5d4   :  { %2426 = dma.done.wait [#allocation3], 256  }
 0x5d5   :  { %2427 = vsyncadd [#allocation3], 4294967040 }
 0x5d6   :  { %2179 = vsyncpa [#allocation3], 1 }

</bundles_post_ra>
